<compile_context>
chip_gen: v7x
topology: tpu7x:2x2x1
jax: 0.10.0
libtpu: 0.0.40
codegen_flags: <defaults>
</compile_context>

<pallas_src>
import jax
import jax.numpy as jnp
from jax.experimental import pallas as pl
from jax.experimental.pallas import tpu as pltpu

BN_EPS = 1e-5


def _round_up(x, m):
    return (x + m - 1) // m * m


def _encoder_kernel(
    x_ref,       # (ROW_TILE, C*HW) f32   one tile of flattened (B*T) frames
    wb_ref,      # (C*HW, F)       bf16   backbone stand-in proj (pool folded in)
    w1_ref,      # (F, H1)         bf16   fc1 with BN1 folded in
    w2_ref,      # (H1, H2)        bf16   fc2 with BN2 folded in
    w3_ref,      # (H2, E)         bf16   fc3
    bias_ref,    # (3, HMAX)       f32    rows = [b1', b2', b3] (lane-padded)
    o_ref,       # (ROW_TILE, E)   f32
):
    h1 = w1_ref.shape[1]
    h2 = w2_ref.shape[1]
    e = w3_ref.shape[1]

    # --- frozen backbone stand-in: avg-pool over HxW folded into the matmul ---
    feat = jnp.dot(x_ref[...].astype(jnp.bfloat16), wb_ref[...],
                   preferred_element_type=jnp.float32)
    feat = jnp.maximum(feat, 0.0)                               # (RT, F) f32

    # --- fc1 (+ folded BN1) -> relu ---
    h = jnp.dot(feat.astype(jnp.bfloat16), w1_ref[...],
                preferred_element_type=jnp.float32) + bias_ref[0:1, :h1]
    h = jnp.maximum(h, 0.0)

    # --- fc2 (+ folded BN2) -> relu ---
    h = jnp.dot(h.astype(jnp.bfloat16), w2_ref[...],
                preferred_element_type=jnp.float32) + bias_ref[1:2, :h2]
    h = jnp.maximum(h, 0.0)

    # dropout: eval mode (training=False) -> identity

    # --- fc3 ---
    out = jnp.dot(h.astype(jnp.bfloat16), w3_ref[...],
                  preferred_element_type=jnp.float32) + bias_ref[2:3, :e]
    o_ref[...] = out.astype(o_ref.dtype)


def res_cnn_encoder(x_3d, params):
    """x_3d: (B, T, C, H, W) float32  ->  (B, T, E) float32."""
    B, T, C, H, W = x_3d.shape
    HW = H * W
    CHW = C * HW
    rows = B * T
    F_ = params["wb"].shape[1]
    H1 = params["w1"].shape[1]
    H2 = params["w2"].shape[1]
    E = params["w3"].shape[1]

    # --- fold inference-mode BatchNorm into fc1 / fc2 (exact affine fold) ---
    s1 = params["g1"] * jax.lax.rsqrt(params["v1"] + BN_EPS)           # (1, H1)
    w1f = params["w1"] * s1
    b1f = (params["b1"] - params["m1"]) * s1 + params["be1"]
    s2 = params["g2"] * jax.lax.rsqrt(params["v2"] + BN_EPS)           # (1, H2)
    w2f = params["w2"] * s2
    b2f = (params["b2"] - params["m2"]) * s2 + params["be2"]

    # --- fold the global average pool into the backbone projection weights ---
    # feat[r,f] = relu( sum_{c,hw} x[r, c*HW+hw] * wb[c,f] / HW )
    wb_exp = jnp.repeat(params["wb"], HW, axis=0) * (1.0 / HW)          # (C*HW, F)

    # --- pack the remaining biases into a single operand ---
    HMAX = max(H1, H2, E)

    def _padlane(v):
        return jnp.pad(v, ((0, 0), (0, HMAX - v.shape[1])))

    bias_pack = jnp.concatenate(
        [_padlane(b1f), _padlane(b2f), _padlane(params["b3"])], axis=0
    ).astype(jnp.float32)                                               # (3, HMAX)

    # --- bf16 weights feed the MXU; accumulation stays f32 inside the kernel ---
    wb_bf = wb_exp.astype(jnp.bfloat16)
    w1_bf = w1f.astype(jnp.bfloat16)
    w2_bf = w2f.astype(jnp.bfloat16)
    w3_bf = params["w3"].astype(jnp.bfloat16)

    # --- collapse (B, T) into one row axis: pure reshape, no transposes ---
    x_rows = x_3d.reshape(rows, CHW)

    # Row tiling: large tiles amortize per-step pipeline overhead and give the
    # MXU full-height matmuls; cap by a VMEM budget (v7x has only 64 MiB).
    x_vmem_budget = 16 * 1024 * 1024          # double-buffered activation budget
    bytes_per_row = CHW * 4
    max_rows_fit = max(8, (x_vmem_budget // (2 * bytes_per_row)) // 8 * 8)
    row_tile = min(256, max_rows_fit, _round_up(rows, 8))
    rows_pad = _round_up(rows, row_tile)
    if rows_pad != rows:
        x_rows = jnp.pad(x_rows, ((0, rows_pad - rows), (0, 0)))
    n_tiles = rows_pad // row_tile

    out = pl.pallas_call(
        _encoder_kernel,
        out_shape=jax.ShapeDtypeStruct((rows_pad, E), jnp.float32),
        grid_spec=pl.GridSpec(
            grid=(n_tiles,),
            in_specs=[
                pl.BlockSpec((row_tile, CHW), lambda r: (r, 0)),   # x row tile
                pl.BlockSpec((CHW, F_), lambda r: (0, 0)),         # wb (pool folded)
                pl.BlockSpec((F_, H1), lambda r: (0, 0)),          # w1'
                pl.BlockSpec((H1, H2), lambda r: (0, 0)),          # w2'
                pl.BlockSpec((H2, E), lambda r: (0, 0)),           # w3
                pl.BlockSpec((3, HMAX), lambda r: (0, 0)),         # packed biases
            ],
            out_specs=pl.BlockSpec((row_tile, E), lambda r: (r, 0)),
        ),
        compiler_params=pltpu.CompilerParams(
            dimension_semantics=("parallel",),
            vmem_limit_bytes=48 * 1024 * 1024,
        ),
    )(x_rows, wb_bf, w1_bf, w2_bf, w3_bf, bias_pack)

    # row r = b*T + t  ->  (B, T, E), matching torch.stack(...).transpose_(0, 1)
    return out[:rows].reshape(B, T, E)


def _reference(x_3d, params):
    """Pure-JAX f32 reference of the same forward (for a sanity check)."""
    B, T, C, H, W = x_3d.shape
    x = x_3d.reshape(B, T, C, H * W)
    pooled = jnp.mean(x, axis=-1)                                   # (B, T, C)
    feat = jnp.maximum(pooled @ params["wb"], 0.0)
    h = feat @ params["w1"] + params["b1"]
    h = params["g1"] * (h - params["m1"]) * jax.lax.rsqrt(params["v1"] + BN_EPS) \
        + params["be1"]
    h = jnp.maximum(h, 0.0)
    h = h @ params["w2"] + params["b2"]
    h = params["g2"] * (h - params["m2"]) * jax.lax.rsqrt(params["v2"] + BN_EPS) \
        + params["be2"]
    h = jnp.maximum(h, 0.0)
    return h @ params["w3"] + params["b3"]


def init_params(key, C, feat_dim, h1, h2, embed_dim):
    ks = jax.random.split(key, 8)
    scale = 0.05

    def rnd(k, shape):
        return scale * jax.random.normal(k, shape, dtype=jnp.float32)

    return {
        "wb": rnd(ks[0], (C, feat_dim)),
        "w1": rnd(ks[1], (feat_dim, h1)),
        "b1": rnd(ks[2], (1, h1)),
        "w2": rnd(ks[3], (h1, h2)),
        "b2": rnd(ks[4], (1, h2)),
        "w3": rnd(ks[5], (h2, embed_dim)),
        "b3": rnd(ks[6], (1, embed_dim)),
        # BatchNorm1d (inference mode): gamma, beta, running_mean, running_var
        "g1": jnp.ones((1, h1), jnp.float32) + rnd(ks[7], (1, h1)),
        "be1": 0.1 * jnp.ones((1, h1), jnp.float32),
        "m1": 0.05 * jnp.ones((1, h1), jnp.float32),
        "v1": jnp.ones((1, h1), jnp.float32),
        "g2": jnp.ones((1, h2), jnp.float32),
        "be2": -0.1 * jnp.ones((1, h2), jnp.float32),
        "m2": jnp.zeros((1, h2), jnp.float32),
        "v2": 1.2 * jnp.ones((1, h2), jnp.float32),
    }


if __name__ == "__main__":
    key = jax.random.PRNGKey(0)
    k_x, k_p = jax.random.split(key)

    # small shapes consistent with the module's forward
    B, T, C, H, W = 2, 3, 4, 16, 16
    FEAT, H1, H2, EMBED = 128, 128, 128, 128

    x_3d = jax.random.normal(k_x, (B, T, C, H, W), dtype=jnp.float32)
    params = init_params(k_p, C, FEAT, H1, H2, EMBED)

    out = res_cnn_encoder(x_3d, params)
    out = jax.block_until_ready(out)

    assert out.shape == (B, T, EMBED), out.shape
    assert out.dtype == jnp.float32
    assert bool(jnp.all(jnp.isfinite(out)))

    # sanity check vs. pure-JAX f32 reference (loose tolerance: bf16 matmuls)
    ref = _reference(x_3d, params)
    max_err = float(jnp.max(jnp.abs(out - ref)))
    assert max_err < 1e-2, max_err

    print("KERNEL_OK")
</pallas_src>

<mosaic_0001>
module attributes {stable_mosaic.version = 11 : i64} {
  func.func @_encoder_kernel(%arg0: i32, %arg1: memref<8x1024xf32, #tpu.memory_space<vmem>>, %arg2: memref<1024x128xbf16, #tpu.memory_space<vmem>>, %arg3: memref<128x128xbf16, #tpu.memory_space<vmem>>, %arg4: memref<128x128xbf16, #tpu.memory_space<vmem>>, %arg5: memref<128x128xbf16, #tpu.memory_space<vmem>>, %arg6: memref<3x128xf32, #tpu.memory_space<vmem>>, %arg7: memref<8x128xf32, #tpu.memory_space<vmem>>) attributes {dimension_semantics = [#tpu.dimension_semantics<parallel>], iteration_bounds = array<i64: 1>, scalar_prefetch = 0 : i64, scratch_operands = 0 : i64, tpu.core_type = #tpu.core_type<tc>, window_params = [{transform_indices = @transform_0, window_bounds = array<i64: 8, 1024>}, {pipeline_mode = #tpu.pipeline_mode<synchronous>, transform_indices = @transform_1, window_bounds = array<i64: 1024, 128>}, {pipeline_mode = #tpu.pipeline_mode<synchronous>, transform_indices = @transform_2, window_bounds = array<i64: 128, 128>}, {pipeline_mode = #tpu.pipeline_mode<synchronous>, transform_indices = @transform_3, window_bounds = array<i64: 128, 128>}, {pipeline_mode = #tpu.pipeline_mode<synchronous>, transform_indices = @transform_4, window_bounds = array<i64: 128, 128>}, {pipeline_mode = #tpu.pipeline_mode<synchronous>, transform_indices = @transform_5, window_bounds = array<i64: 3, 128>}, {transform_indices = @transform_6, window_bounds = array<i64: 8, 128>}]} {
    %c0 = arith.constant 0 : index
    %c0_0 = arith.constant 0 : index
    %0 = vector.load %arg1[%c0, %c0_0] : memref<8x1024xf32, #tpu.memory_space<vmem>>, vector<8x1024xf32>
    %1 = arith.truncf %0 : vector<8x1024xf32> to vector<8x1024xbf16>
    %c0_1 = arith.constant 0 : index
    %c0_2 = arith.constant 0 : index
    %2 = vector.load %arg2[%c0_1, %c0_2] : memref<1024x128xbf16, #tpu.memory_space<vmem>>, vector<1024x128xbf16>
    %cst = arith.constant dense<0.000000e+00> : vector<8x128xf32>
    %3 = tpu.matmul %1, %2, %cst {dimension_numbers = #tpu.dot_dimension_numbers<[1], [0], [0], [1], [0, 0, 1, 1], [], []>} : vector<8x1024xbf16>, vector<1024x128xbf16>, vector<8x128xf32> -> vector<8x128xf32>
    %cst_3 = arith.constant 0.000000e+00 : f32
    %4 = vector.broadcast %cst_3 : f32 to vector<8x128xf32>
    %5 = arith.maximumf %3, %4 : vector<8x128xf32>
    %6 = arith.truncf %5 : vector<8x128xf32> to vector<8x128xbf16>
    %c0_4 = arith.constant 0 : index
    %c0_5 = arith.constant 0 : index
    %7 = vector.load %arg3[%c0_4, %c0_5] : memref<128x128xbf16, #tpu.memory_space<vmem>>, vector<128x128xbf16>
    %cst_6 = arith.constant dense<0.000000e+00> : vector<8x128xf32>
    %8 = tpu.matmul %6, %7, %cst_6 {dimension_numbers = #tpu.dot_dimension_numbers<[1], [0], [0], [1], [0, 0, 1, 1], [], []>} : vector<8x128xbf16>, vector<128x128xbf16>, vector<8x128xf32> -> vector<8x128xf32>
    %c0_7 = arith.constant 0 : index
    %c0_8 = arith.constant 0 : index
    %9 = vector.load %arg6[%c0_7, %c0_8] : memref<3x128xf32, #tpu.memory_space<vmem>>, vector<1x128xf32>
    %10 = vector.broadcast %9 : vector<1x128xf32> to vector<8x128xf32>
    %11 = arith.addf %8, %10 : vector<8x128xf32>
    %cst_9 = arith.constant 0.000000e+00 : f32
    %12 = vector.broadcast %cst_9 : f32 to vector<8x128xf32>
    %13 = arith.maximumf %11, %12 : vector<8x128xf32>
    %14 = arith.truncf %13 : vector<8x128xf32> to vector<8x128xbf16>
    %c0_10 = arith.constant 0 : index
    %c0_11 = arith.constant 0 : index
    %15 = vector.load %arg4[%c0_10, %c0_11] : memref<128x128xbf16, #tpu.memory_space<vmem>>, vector<128x128xbf16>
    %cst_12 = arith.constant dense<0.000000e+00> : vector<8x128xf32>
    %16 = tpu.matmul %14, %15, %cst_12 {dimension_numbers = #tpu.dot_dimension_numbers<[1], [0], [0], [1], [0, 0, 1, 1], [], []>} : vector<8x128xbf16>, vector<128x128xbf16>, vector<8x128xf32> -> vector<8x128xf32>
    %c1 = arith.constant 1 : index
    %c0_13 = arith.constant 0 : index
    %17 = vector.load %arg6[%c1, %c0_13] : memref<3x128xf32, #tpu.memory_space<vmem>>, vector<1x128xf32>
    %18 = vector.broadcast %17 : vector<1x128xf32> to vector<8x128xf32>
    %19 = arith.addf %16, %18 : vector<8x128xf32>
    %cst_14 = arith.constant 0.000000e+00 : f32
    %20 = vector.broadcast %cst_14 : f32 to vector<8x128xf32>
    %21 = arith.maximumf %19, %20 : vector<8x128xf32>
    %22 = arith.truncf %21 : vector<8x128xf32> to vector<8x128xbf16>
    %c0_15 = arith.constant 0 : index
    %c0_16 = arith.constant 0 : index
    %23 = vector.load %arg5[%c0_15, %c0_16] : memref<128x128xbf16, #tpu.memory_space<vmem>>, vector<128x128xbf16>
    %cst_17 = arith.constant dense<0.000000e+00> : vector<8x128xf32>
    %24 = tpu.matmul %22, %23, %cst_17 {dimension_numbers = #tpu.dot_dimension_numbers<[1], [0], [0], [1], [0, 0, 1, 1], [], []>} : vector<8x128xbf16>, vector<128x128xbf16>, vector<8x128xf32> -> vector<8x128xf32>
    %c2 = arith.constant 2 : index
    %c0_18 = arith.constant 0 : index
    %25 = vector.load %arg6[%c2, %c0_18] : memref<3x128xf32, #tpu.memory_space<vmem>>, vector<1x128xf32>
    %26 = vector.broadcast %25 : vector<1x128xf32> to vector<8x128xf32>
    %27 = arith.addf %24, %26 : vector<8x128xf32>
    %c0_19 = arith.constant 0 : index
    %c0_20 = arith.constant 0 : index
    %28 = vector.load %arg7[%c0_19, %c0_20] : memref<8x128xf32, #tpu.memory_space<vmem>>, vector<8x128xf32>
    tpu.vector_store %arg7[%c0_19, %c0_20], %27 {strides = array<i32>} : memref<8x128xf32, #tpu.memory_space<vmem>>, vector<8x128xf32>,
    return
  }
  func.func @transform_0(%arg0: i32) -> (i32, i32) {
    %c0_i32 = arith.constant 0 : i32
    %c0_i32_0 = arith.constant 0 : i32
    return %arg0, %c0_i32 : i32, i32
  }
  func.func @transform_1(%arg0: i32) -> (i32, i32) {
    %c0_i32 = arith.constant 0 : i32
    %c0_i32_0 = arith.constant 0 : i32
    %c0_i32_1 = arith.constant 0 : i32
    return %c0_i32, %c0_i32_0 : i32, i32
  }
  func.func @transform_2(%arg0: i32) -> (i32, i32) {
    %c0_i32 = arith.constant 0 : i32
    %c0_i32_0 = arith.constant 0 : i32
    %c0_i32_1 = arith.constant 0 : i32
    return %c0_i32, %c0_i32_0 : i32, i32
  }
  func.func @transform_3(%arg0: i32) -> (i32, i32) {
    %c0_i32 = arith.constant 0 : i32
    %c0_i32_0 = arith.constant 0 : i32
    %c0_i32_1 = arith.constant 0 : i32
    return %c0_i32, %c0_i32_0 : i32, i32
  }
  func.func @transform_4(%arg0: i32) -> (i32, i32) {
    %c0_i32 = arith.constant 0 : i32
    %c0_i32_0 = arith.constant 0 : i32
    %c0_i32_1 = arith.constant 0 : i32
    return %c0_i32, %c0_i32_0 : i32, i32
  }
  func.func @transform_5(%arg0: i32) -> (i32, i32) {
    %c0_i32 = arith.constant 0 : i32
    %c0_i32_0 = arith.constant 0 : i32
    %c0_i32_1 = arith.constant 0 : i32
    return %c0_i32, %c0_i32_0 : i32, i32
  }
  func.func @transform_6(%arg0: i32) -> (i32, i32) {
    %c0_i32 = arith.constant 0 : i32
    %c0_i32_0 = arith.constant 0 : i32
    return %arg0, %c0_i32 : i32, i32
  }
}

</mosaic_0001>

<bundles_post_ra>
// kernel: tpu_custom_call.1
= control target key start
LH: loop header
LB: loop body
LE: loop exit
PB: predicated region body
PF: predicated region fallthrough
CT: control target
= control target key end

     0   :  { %11 = vsyncpa [#allocation3], 0  ;;  %s1802_s0 = inlined_call_operand.hbm [shape: f32[8,1024], index: 0, kind: input, shape index: {}]   ;;  %s1803_s1 = inlined_call_operand.hbm [shape: bf16[1024,128], index: 1, kind: input, shape index: {}]   ;;  %s1804_s2 = inlined_call_operand.hbm [shape: bf16[128,128], index: 2, kind: input, shape index: {}]   ;;  %s1805_s3 = inlined_call_operand.hbm [shape: bf16[128,128], index: 3, kind: input, shape index: {}]   ;;  %s1806_s4 = inlined_call_operand.hbm [shape: bf16[128,128], index: 4, kind: input, shape index: {}]   ;;  %s1807_s5 = inlined_call_operand.vmem [shape: f32[3,128], index: 5, kind: input, shape index: {}]   ;;  %s1808_s6 = inlined_call_operand.hbm [shape: f32[8,128], index: 6, kind: output, shape index: {}]  }
   0x1   :  { %12 = vsyncpa [#allocation6], 0 }
   0x2   :  { %13 = vsyncpa [#allocation9], 0 }
   0x3   :  { %14 = vsyncpa [#allocation4], 0  ;;  %s1634_s21 = smov [#allocation5]   ;;  %s1494_s25 = scalar_lea.hbm %s1803_s1, 8192 }
   0x4   :  { %s30_s22 = sshll.u32 %s1634_s21, 4  ;;  %p1495_p0 = scmp.ne.s32.totalorder %s1803_s1, %s1494_s25  ;;  %s31_s22 = int_to_ptr.vmem [resolvable:$true] %s30_s22 }
   0x5   :  { %p1498_p1 = scmp.lt.u32.totalorder %s1494_s25, %s1803_s1 }
   0x7   :  { %p1500_p2 = pnand %p1498_p1, %p1495_p0 }
   0x9   :  { %1503 = shalt.err (!%p1500_p2)
}
   0xa   :  { %s1504_s30 = scalar_lea.vmem %s31_s22, 8192  ;;  %p1509_p4 = scmp.lt.s32.totalorder %s31_s22, %s31_s22 }
   0xb   :  { %p1505_p3 = scmp.ne.s32.totalorder %s31_s22, %s1504_s30  ;;  %p1510_p5 = scmp.lt.s32.totalorder %s1504_s30, %s1504_s30 }
   0xd   :  { %p1511_p6 = por %p1510_p5, %p1509_p4 }
   0xf   :  { %p1512_p7 = pnand %p1511_p6, %p1505_p3 }
  0x11   :  { %1515 = shalt.err (!%p1512_p7)
}
  0x12   :  { %s1635_s7 = smov 64   ;;  %s1636_s8 = smov 4  }
  0x13   :  { %36 = dma.hbm_to_vmem [thread:$0]  %s1803_s1, 8192, %s31_s22, [#allocation6], %s1635_s7, %s1635_s7, %s1636_s8  }
  0x14   :  { %s1637_s11 = smov [#allocation8]   ;;  %s1638_s13 = smov [#allocation2]  }
  0x15   :  { %s54_s12 = sshll.u32 %s1637_s11, 4  ;;  %s21_s14 = sshll.u32 %s1638_s13, 4  ;;  %s55_s12 = int_to_ptr.vmem [resolvable:$true] %s54_s12  ;;  %s22_s14 = int_to_ptr.vmem [resolvable:$true] %s21_s14 }
  0x16   :  { %s1516_s17 = scalar_lea.hbm %s1805_s3, 1024 }
  0x17   :  { %p1517_p8 = scmp.ne.s32.totalorder %s1805_s3, %s1516_s17  ;;  %p1520_p9 = scmp.lt.u32.totalorder %s1516_s17, %s1805_s3 }
  0x19   :  { %p1522_p10 = pnand %p1520_p9, %p1517_p8 }
  0x1b   :  { %1525 = shalt.err (!%p1522_p10)
}
  0x1c   :  { %s1526_s1 = scalar_lea.vmem %s55_s12, 1024  ;;  %p1531_p12 = scmp.lt.s32.totalorder %s55_s12, %s55_s12 }
  0x1d   :  { %p1527_p11 = scmp.ne.s32.totalorder %s55_s12, %s1526_s1  ;;  %p1532_p13 = scmp.lt.s32.totalorder %s1526_s1, %s1526_s1 }
  0x1f   :  { %p1533_p0 = por %p1532_p13, %p1531_p12 }
  0x21   :  { %p1534_p1 = pnand %p1533_p0, %p1527_p11 }
  0x23   :  { %1537 = shalt.err (!%p1534_p1)
}
  0x24   :  { %60 = dma.hbm_to_vmem [thread:$0]  %s1805_s3, 1024, %s55_s12, [#allocation9], %s1635_s7, %s1635_s7, %s1636_s8  }
  0x25   :  { %s1538_s26 = scalar_lea.hbm %s1802_s0, 1024 }
  0x26   :  { %p1539_p2 = scmp.ne.s32.totalorder %s1802_s0, %s1538_s26  ;;  %p1542_p3 = scmp.lt.u32.totalorder %s1538_s26, %s1802_s0 }
  0x28   :  { %p1544_p4 = pnand %p1542_p3, %p1539_p2 }
  0x2a   :  { %1547 = shalt.err (!%p1544_p4)
}
  0x2b   :  { %s1548_s9 = scalar_lea.vmem %s22_s14, 1024  ;;  %p1553_p6 = scmp.lt.s32.totalorder %s22_s14, %s22_s14 }
  0x2c   :  { %p1549_p5 = scmp.ne.s32.totalorder %s22_s14, %s1548_s9  ;;  %p1554_p7 = scmp.lt.s32.totalorder %s1548_s9, %s1548_s9 }
  0x2e   :  { %p1555_p8 = por %p1554_p7, %p1553_p6 }
  0x30   :  { %p1556_p9 = pnand %p1555_p8, %p1549_p5 }
  0x32   :  { %1559 = shalt.err (!%p1556_p9)
}
  0x33   :  { %24 = dma.hbm_to_vmem [thread:$0]  %s1802_s0, 1024, %s22_s14, [#allocation3]  }
  0x34   :  { %s1639_s11 = smov [#allocation7]   ;;  %s1640_s13 = smov [#allocation10]  }
  0x35   :  { %s42_s12 = sshll.u32 %s1639_s11, 4  ;;  %s66_s15 = sshll.u32 %s1640_s13, 4  ;;  %s43_s12 = int_to_ptr.vmem [resolvable:$true] %s42_s12  ;;  %s67_s15 = int_to_ptr.vmem [resolvable:$true] %s66_s15 }
  0x36   :  { %s1560_s18 = scalar_lea.hbm %s1804_s2, 1024 }
  0x37   :  { %p1561_p10 = scmp.ne.s32.totalorder %s1804_s2, %s1560_s18  ;;  %p1564_p11 = scmp.lt.u32.totalorder %s1560_s18, %s1804_s2 }
  0x39   :  { %p1566_p12 = pnand %p1564_p11, %p1561_p10 }
  0x3b   :  { %1569 = shalt.err (!%p1566_p12)
}
  0x3c   :  { %s1570_s0 = scalar_lea.vmem %s43_s12, 1024  ;;  %p1575_p0 = scmp.lt.s32.totalorder %s43_s12, %s43_s12 }
  0x3d   :  { %p1571_p13 = scmp.ne.s32.totalorder %s43_s12, %s1570_s0  ;;  %p1576_p1 = scmp.lt.s32.totalorder %s1570_s0, %s1570_s0 }
  0x3f   :  { %p1577_p2 = por %p1576_p1, %p1575_p0 }
  0x41   :  { %p1578_p3 = pnand %p1577_p2, %p1571_p13 }
  0x43   :  { %1581 = shalt.err (!%p1578_p3)
}
  0x44   :  { %48 = dma.hbm_to_vmem [thread:$0]  %s1804_s2, 1024, %s43_s12, [#allocation6], %s1635_s7, %s1635_s7, %s1636_s8  }
  0x45   :  { %s1582_s25 = scalar_lea.hbm %s1806_s4, 1024 }
  0x46   :  { %p1583_p4 = scmp.ne.s32.totalorder %s1806_s4, %s1582_s25  ;;  %p1586_p5 = scmp.lt.u32.totalorder %s1582_s25, %s1806_s4 }
  0x48   :  { %p1588_p6 = pnand %p1586_p5, %p1583_p4 }
  0x4a   :  { %1591 = shalt.err (!%p1588_p6)
}
  0x4b   :  { %s1592_s30 = scalar_lea.vmem %s67_s15, 1024  ;;  %p1597_p8 = scmp.lt.s32.totalorder %s67_s15, %s67_s15 }
  0x4c   :  { %p1593_p7 = scmp.ne.s32.totalorder %s67_s15, %s1592_s30  ;;  %p1598_p9 = scmp.lt.s32.totalorder %s1592_s30, %s1592_s30 }
  0x4e   :  { %p1599_p10 = por %p1598_p9, %p1597_p8 }
  0x50   :  { %p1600_p11 = pnand %p1599_p10, %p1593_p7 }
  0x52   :  { %1603 = shalt.err (!%p1600_p11)
}
  0x53   :  { %72 = dma.hbm_to_vmem [thread:$0]  %s1806_s4, 1024, %s67_s15, [#allocation9], %s1635_s7, %s1635_s7, %s1636_s8  }
  0x54   :  { %1626 = dma.done.wait [#allocation3], 1024  }
  0x55   :  { %1627 = vsyncadd [#allocation3], 4294966272 }
  0x56   :  { %1628 = dma.done.wait [#allocation6], 9216  }
  0x57   :  { %1629 = vsyncadd [#allocation6], 4294958080 }
  0x58   :  { %1630 = dma.done.wait [#allocation9], 2048  }
  0x59   :  { %1631 = vsyncadd [#allocation9], 4294965248  ;;  %v1406_v0 = vld [vmem:[#allocation5 + $0x40] sm:$0xff]   ;;  %v1410_v4 = vld [vmem:[#allocation5 + $0x48] sm:$0xff]   ;;  %vm1642_vm0 = vmmov 0   ;;  %s1643_s12 = smov [#allocation11]  }
  0x5a   :  { %v1407_v1 = vld [vmem:[#allocation5 + $0xc0] sm:$0xff]   ;;  %1221 = vmatprep.subr.bf16.mxu0 %v1406_v0  ;;  %v1411_v5 = vld [vmem:[#allocation5 + $0xc8] sm:$0xff]   ;;  %v1414_v8 = vld [vmem:[#allocation5 + $0x50] sm:$0xff]   ;;  %s1119_s13 = sshll.u32 %s1643_s12, 4  ;;  %s1120_s13 = int_to_ptr.vmem [resolvable:$true] %s1119_s13 }
  0x5b   :  { %v1408_v2 = vld [vmem:[#allocation5] sm:$0xff]   ;;  %1243 = vmatprep.subr.bf16.mxu1 %v1407_v1  ;;  %v1412_v6 = vld [vmem:[#allocation5 + $0x8] sm:$0xff]   ;;  %v1415_v9 = vld [vmem:[#allocation5 + $0xd0] sm:$0xff]   ;;  %s1604_s15 = scalar_lea.vmem %s1120_s13, 128  ;;  %p1609_p13 = scmp.lt.s32.totalorder %s1120_s13, %s1120_s13 }
  0x5c   :  { %v1409_v3 = vld [vmem:[#allocation5 + $0x80] sm:$0xff]   ;;  %1222 = vmatpush3.bf16.msra.mxu0 %v1408_v2  ;;  %v1413_v7 = vld [vmem:[#allocation5 + $0x88] sm:$0xff]   ;;  %v1416_v10 = vld [vmem:[#allocation5 + $0x10] sm:$0xff]   ;;  %p1605_p12 = scmp.ne.s32.totalorder %s1120_s13, %s1604_s15  ;;  %p1610_p0 = scmp.lt.s32.totalorder %s1604_s15, %s1604_s15 }
  0x5d   :  { %1244 = vmatpush3.bf16.msra.mxu1 %v1409_v3  ;;  %1223 = vmatprep.subr.bf16.mxu0 %v1410_v4  ;;  %v1417_v11 = vld [vmem:[#allocation5 + $0x90] sm:$0xff]   ;;  %v1418_v12 = vld [vmem:[#allocation5 + $0x58] sm:$0xff]   ;;  %v1422_v16 = vld [vmem:[#allocation5 + $0x60] sm:$0xff]  }
  0x5e   :  { %1245 = vmatprep.subr.bf16.mxu1 %v1411_v5  ;;  %v1419_v13 = vld [vmem:[#allocation5 + $0xd8] sm:$0xff]   ;;  %v1423_v17 = vld [vmem:[#allocation5 + $0xe0] sm:$0xff]   ;;  %v1426_v20 = vld [vmem:[#allocation5 + $0x68] sm:$0xff]   ;;  %p1611_p1 = por %p1610_p0, %p1609_p13 }
  0x5f   :  { %v1420_v14 = vld [vmem:[#allocation5 + $0x18] sm:$0xff]   ;;  %v1424_v18 = vld [vmem:[#allocation5 + $0x20] sm:$0xff]   ;;  %v1427_v21 = vld [vmem:[#allocation5 + $0xe8] sm:$0xff]  }
  0x60   :  { %1224 = vmatpush3.bf16.msra.mxu0 %v1412_v6  ;;  %v1421_v15 = vld [vmem:[#allocation5 + $0x98] sm:$0xff]   ;;  %v1425_v19 = vld [vmem:[#allocation5 + $0xa0] sm:$0xff]   ;;  %v1428_v22 = vld [vmem:[#allocation5 + $0x28] sm:$0xff]   ;;  %p1612_p2 = pnand %p1611_p1, %p1605_p12 }
  0x61   :  { %1246 = vmatpush3.bf16.msra.mxu1 %v1413_v7  ;;  %1225 = vmatprep.subr.bf16.mxu0 %v1414_v8  ;;  %v1429_v23 = vld [vmem:[#allocation5 + $0xa8] sm:$0xff]   ;;  %v1430_v24 = vld [vmem:[#allocation5 + $0x70] sm:$0xff]   ;;  %v1434_v28 = vld [vmem:[#allocation5 + $0x78] sm:$0xff]  }
  0x62   :  { %1247 = vmatprep.subr.bf16.mxu1 %v1415_v9  ;;  %v1431_v25 = vld [vmem:[#allocation5 + $0xf0] sm:$0xff]   ;;  %v1435_v29 = vld [vmem:[#allocation5 + $0xf8] sm:$0xff]   ;;  %v92_v32 = vld [vmem:[#allocation2 + $0x8] sm:$0xff] }
  0x63   :  { %v1432_v26 = vld [vmem:[#allocation5 + $0x30] sm:$0xff]   ;;  %v1436_v30 = vld [vmem:[#allocation5 + $0x38] sm:$0xff]   ;;  %v91_v34 = vld [vmem:[#allocation2] sm:$0xff]  ;;  %v100_v35 = vpack.c.bf16 %v92_v32, %v92_v32 }
  0x64   :  { %1226 = vmatpush3.bf16.msra.mxu0 %v1416_v10  ;;  %v1433_v27 = vld [vmem:[#allocation5 + $0xb0] sm:$0xff]   ;;  %v1437_v31 = vld [vmem:[#allocation5 + $0xb8] sm:$0xff]   ;;  %v99_v37 = vpack.c.bf16 %v91_v34, %v91_v34  ;;  %v1438_v40 = vld [vmem:[#allocation5 + $0x140] sm:$0xff]  }
  0x65   :  { %1248 = vmatpush3.bf16.msra.mxu1 %v1417_v11  ;;  %1227 = vmatprep.subr.bf16.mxu0 %v1418_v12  ;;  %v94_v33 = vld [vmem:[#allocation2 + $0x18] sm:$0xff]  ;;  %v93_v38 = vld [vmem:[#allocation2 + $0x10] sm:$0xff]  ;;  %v1439_v41 = vld [vmem:[#allocation5 + $0x1c0] sm:$0xff]  }
  0x66   :  { %1249 = vmatprep.subr.bf16.mxu1 %v1419_v13  ;;  %v102_v36 = vpack.c.bf16 %v94_v33, %v94_v33  ;;  %v101_v39 = vpack.c.bf16 %v93_v38, %v93_v38  ;;  %651 = vmatprep.mubr.bf16.mxu0 %v100_v35  ;;  %v1440_v42 = vld [vmem:[#allocation5 + $0x100] sm:$0xff]   ;;  %v1442_v44 = vld [vmem:[#allocation5 + $0x148] sm:$0xff]   ;;  %v1446_v48 = vld [vmem:[#allocation5 + $0x150] sm:$0xff]  }
  0x67   :  { %v1441_v43 = vld [vmem:[#allocation5 + $0x180] sm:$0xff]   ;;  %v1443_v45 = vld [vmem:[#allocation5 + $0x1c8] sm:$0xff]   ;;  %v1447_v49 = vld [vmem:[#allocation5 + $0x1d0] sm:$0xff]  }
  0x68   :  { %1228 = vmatpush3.bf16.msra.mxu0 %v1420_v14  ;;  %691 = vmatprep.mubr.bf16.mxu1 %v102_v36  ;;  %v1444_v46 = vld [vmem:[#allocation5 + $0x108] sm:$0xff]   ;;  %v1448_v50 = vld [vmem:[#allocation5 + $0x110] sm:$0xff]   ;;  %v1450_v52 = vld [vmem:[#allocation5 + $0x158] sm:$0xff]  }
  0x69   :  { %1250 = vmatpush3.bf16.msra.mxu1 %v1421_v15  ;;  %1229 = vmatprep.subr.bf16.mxu0 %v1422_v16  ;;  %v1445_v47 = vld [vmem:[#allocation5 + $0x188] sm:$0xff]   ;;  %v1449_v51 = vld [vmem:[#allocation5 + $0x190] sm:$0xff]   ;;  %v1451_v53 = vld [vmem:[#allocation5 + $0x1d8] sm:$0xff]  }
  0x6a   :  { %1251 = vmatprep.subr.bf16.mxu1 %v1423_v17  ;;  %v1452_v54 = vld [vmem:[#allocation5 + $0x118] sm:$0xff]   ;;  %v1454_v56 = vld [vmem:[#allocation5 + $0x160] sm:$0xff]   ;;  %v1458_v60 = vld [vmem:[#allocation5 + $0x168] sm:$0xff]   ;;  %v1641_v17 = vmov 0.0  }
  0x6b   :  { %v1453_v55 = vld [vmem:[#allocation5 + $0x198] sm:$0xff]   ;;  %v1455_v57 = vld [vmem:[#allocation5 + $0x1e0] sm:$0xff]   ;;  %v1459_v61 = vld [vmem:[#allocation5 + $0x1e8] sm:$0xff]  }
  0x6c   :  { %1230 = vmatpush3.bf16.msra.mxu0 %v1424_v18  ;;  %v1456_v58 = vld [vmem:[#allocation5 + $0x120] sm:$0xff]   ;;  %v1460_v62 = vld [vmem:[#allocation5 + $0x128] sm:$0xff]   ;;  %v1462_v0 = vld [vmem:[#allocation5 + $0x170] sm:$0xff]  }
  0x6d   :  { %1252 = vmatpush3.bf16.msra.mxu1 %v1425_v19  ;;  %1231 = vmatprep.subr.bf16.mxu0 %v1426_v20  ;;  %v1457_v59 = vld [vmem:[#allocation5 + $0x1a0] sm:$0xff]   ;;  %v1461_v63 = vld [vmem:[#allocation5 + $0x1a8] sm:$0xff]   ;;  %v1463_v1 = vld [vmem:[#allocation5 + $0x1f0] sm:$0xff]  }
  0x6e   :  { %1253 = vmatprep.subr.bf16.mxu1 %v1427_v21  ;;  %v1464_v2 = vld [vmem:[#allocation5 + $0x130] sm:$0xff]   ;;  %v1466_v4 = vld [vmem:[#allocation5 + $0x178] sm:$0xff]   ;;  %v96_v8 = vld [vmem:[#allocation2 + $0x28] sm:$0xff] }
  0x6f   :  { %v1465_v3 = vld [vmem:[#allocation5 + $0x1b0] sm:$0xff]   ;;  %v1467_v5 = vld [vmem:[#allocation5 + $0x1f8] sm:$0xff]   ;;  %v104_v10 = vpack.c.bf16 %v96_v8, %v96_v8  ;;  %v95_v12 = vld [vmem:[#allocation2 + $0x20] sm:$0xff] }
  0x70   :  { %1232 = vmatpush3.bf16.msra.mxu0 %v1428_v22  ;;  %v1468_v6 = vld [vmem:[#allocation5 + $0x138] sm:$0xff]   ;;  %v97_v13 = vld [vmem:[#allocation2 + $0x30] sm:$0xff]  ;;  %v103_v14 = vpack.c.bf16 %v95_v12, %v95_v12  ;;  %v1470_v16 = vld [vmem:[#allocation7] sm:$0xff]  }
  0x71   :  { %1254 = vmatpush3.bf16.msra.mxu1 %v1429_v23  ;;  %1233 = vmatprep.subr.bf16.mxu0 %v1430_v24  ;;  %v1469_v7 = vld [vmem:[#allocation5 + $0x1b8] sm:$0xff]   ;;  %v105_v15 = vpack.c.bf16 %v97_v13, %v97_v13  ;;  %v1471_v18 = vld [vmem:[#allocation7 + $0x8] sm:$0xff]   ;;  %v1472_v19 = vld [vmem:[#allocation7 + $0x10] sm:$0xff]  }
  0x72   :  { %1255 = vmatprep.subr.bf16.mxu1 %v1431_v25  ;;  %v98_v9 = vld [vmem:[#allocation2 + $0x38] sm:$0xff]  ;;  %v1474_v21 = vld [vmem:[#allocation7 + $0x20] sm:$0xff]   ;;  %v1475_v22 = vld [vmem:[#allocation7 + $0x28] sm:$0xff]  }
  0x73   :  { %v106_v11 = vpack.c.bf16 %v98_v9, %v98_v9  ;;  %v1473_v20 = vld [vmem:[#allocation7 + $0x18] sm:$0xff]   ;;  %v1476_v23 = vld [vmem:[#allocation7 + $0x30] sm:$0xff]   ;;  %v1478_v25 = vld [vmem:[#allocation8] sm:$0xff]  }
  0x74   :  { %1234 = vmatpush3.bf16.msra.mxu0 %v1432_v26  ;;  %v1477_v24 = vld [vmem:[#allocation7 + $0x38] sm:$0xff]   ;;  %v1479_v26 = vld [vmem:[#allocation8 + $0x8] sm:$0xff]   ;;  %v1492_v8 = vld [vmem:[#allocation10 + $0x30] sm:$0xff]  }
  0x75   :  { %1256 = vmatpush3.bf16.msra.mxu1 %v1433_v27  ;;  %1235 = vmatprep.subr.bf16.mxu0 %v1434_v28  ;;  %v1480_v27 = vld [vmem:[#allocation8 + $0x10] sm:$0xff]   ;;  %v1481_v28 = vld [vmem:[#allocation8 + $0x18] sm:$0xff]  }
  0x76   :  { %1257 = vmatprep.subr.bf16.mxu1 %v1435_v29  ;;  %v1482_v29 = vld [vmem:[#allocation8 + $0x20] sm:$0xff]   ;;  %v1493_v9 = vld [vmem:[#allocation10 + $0x38] sm:$0xff]  }
  0x78   :  { %1236 = vmatpush3.bf16.msra.mxu0 %v1436_v30  ;;  %v1483_v30 = vld [vmem:[#allocation8 + $0x28] sm:$0xff]  }
  0x79   :  { %1258 = vmatpush3.bf16.msra.mxu1 %v1437_v31  ;;  %1265 = vmatprep.subr.bf16.mxu0 %v1438_v40 }
  0x7a   :  { %1287 = vmatprep.subr.bf16.mxu1 %v1439_v41 }
  0x7b   :  { %652 = vmatmul.mubr.bf16.vlgmr.msra.gmra.mrb[0].mxu0 %v99_v37 }
  0x7c   :  { %692 = vmatmul.mubr.bf16.vlgmr.msra.gmra.mrb[0].mxu1 %v101_v39  ;;  %1266 = vmatpush3.bf16.msra.mxu0 %v1440_v42 }
  0x7d   :  { %1288 = vmatpush3.bf16.msra.mxu1 %v1441_v43  ;;  %1267 = vmatprep.subr.bf16.mxu0 %v1442_v44 }
  0x7e   :  { %1289 = vmatprep.subr.bf16.mxu1 %v1443_v45  ;;  %731 = vmatprep.mubr.bf16.mxu0 %v104_v10  ;;  %v1203_v10 = vld [vmem:[%s1807_s5 + $0x1] ss:$0 sm:$0xff] }
  0x7f   :  { %771 = vmatprep.mubr.bf16.mxu1 %v106_v11 }
  0x80   :  { %1268 = vmatpush3.bf16.msra.mxu0 %v1444_v46 }
  0x81   :  { %1290 = vmatpush3.bf16.msra.mxu1 %v1445_v47  ;;  %1269 = vmatprep.subr.bf16.mxu0 %v1446_v48 }
  0x82   :  { %1291 = vmatprep.subr.bf16.mxu1 %v1447_v49 }
  0x84   :  { %1270 = vmatpush3.bf16.msra.mxu0 %v1448_v50 }
  0x85   :  { %1292 = vmatpush3.bf16.msra.mxu1 %v1449_v51  ;;  %1271 = vmatprep.subr.bf16.mxu0 %v1450_v52 }
  0x86   :  { %1293 = vmatprep.subr.bf16.mxu1 %v1451_v53 }
  0x88   :  { %1272 = vmatpush3.bf16.msra.mxu0 %v1452_v54 }
  0x89   :  { %1294 = vmatpush3.bf16.msra.mxu1 %v1453_v55  ;;  %1273 = vmatprep.subr.bf16.mxu0 %v1454_v56  ;;  %v1484_v56 = vld [vmem:[#allocation8 + $0x30] sm:$0xff]  }
  0x8a   :  { %1295 = vmatprep.subr.bf16.mxu1 %v1455_v57  ;;  %v1485_v57 = vld [vmem:[#allocation8 + $0x38] sm:$0xff]  }
  0x8c   :  { %1274 = vmatpush3.bf16.msra.mxu0 %v1456_v58  ;;  %v1486_v58 = vld [vmem:[#allocation10] sm:$0xff]  }
  0x8d   :  { %1296 = vmatpush3.bf16.msra.mxu1 %v1457_v59  ;;  %1275 = vmatprep.subr.bf16.mxu0 %v1458_v60  ;;  %v1487_v59 = vld [vmem:[#allocation10 + $0x8] sm:$0xff]   ;;  %v1488_v60 = vld [vmem:[#allocation10 + $0x10] sm:$0xff]  }
  0x8e   :  { %1297 = vmatprep.subr.bf16.mxu1 %v1459_v61  ;;  %v1489_v61 = vld [vmem:[#allocation10 + $0x18] sm:$0xff]  }
  0x90   :  { %1276 = vmatpush3.bf16.msra.mxu0 %v1460_v62  ;;  %v1490_v62 = vld [vmem:[#allocation10 + $0x20] sm:$0xff]  }
  0x91   :  { %1298 = vmatpush3.bf16.msra.mxu1 %v1461_v63  ;;  %1277 = vmatprep.subr.bf16.mxu0 %v1462_v0  ;;  %v1491_v63 = vld [vmem:[#allocation10 + $0x28] sm:$0xff]   ;;  %v1194_v0 = vld [vmem:[%s1807_s5] ss:$0 sm:$0xff] }
  0x92   :  { %1299 = vmatprep.subr.bf16.mxu1 %v1463_v1 }
  0x94   :  { %1278 = vmatpush3.bf16.msra.mxu0 %v1464_v2 }
  0x95   :  { %1300 = vmatpush3.bf16.msra.mxu1 %v1465_v3  ;;  %1279 = vmatprep.subr.bf16.mxu0 %v1466_v4 }
  0x96   :  { %1301 = vmatprep.subr.bf16.mxu1 %v1467_v5 }
  0x98   :  { %1280 = vmatpush3.bf16.msra.mxu0 %v1468_v6 }
  0x99   :  { %1302 = vmatpush3.bf16.msra.mxu1 %v1469_v7  ;;  %1336 = vmatprep.subr.bf16.mxu0 %v1641_v17 }
  0x9a   :  { %1356 = vmatprep.subr.bf16.mxu1 %v1641_v17 }
  0x9b   :  { %732 = vmatmul.mubr.bf16.vlgmr.msra.gmra.mrb[4].mxu0 %v103_v14 }
  0x9c   :  { %772 = vmatmul.mubr.bf16.vlgmr.msra.gmra.mrb[4].mxu1 %v105_v15  ;;  %1337 = vmatpush3.bf16.msra.mxu0 %v1470_v16 }
  0x9d   :  { %1338 = vmatprep.subr.bf16.mxu0 %v1641_v17  ;;  %1352 = vmatprep.mubr.msk.bf16.mxu0 %vm1642_vm0, %v1641_v17 }
  0x9e   :  { %1372 = vmatprep.mubr.msk.bf16.mxu1 %vm1642_vm0, %v1641_v17  ;;  %1357 = vmatpush3.bf16.msra.mxu1 %v1478_v25 }
  0x9f   :  { %1358 = vmatprep.subr.bf16.mxu1 %v1641_v17 }
  0xa0   :  { %1339 = vmatpush3.bf16.msra.mxu0 %v1471_v18 }
  0xa1   :  { %1340 = vmatprep.subr.bf16.mxu0 %v1641_v17 }
  0xa2   :  { %1359 = vmatpush3.bf16.msra.mxu1 %v1479_v26 }
  0xa3   :  { %1360 = vmatprep.subr.bf16.mxu1 %v1641_v17 }
  0xa4   :  { %1341 = vmatpush3.bf16.msra.mxu0 %v1472_v19  ;;  %v1212_v19 = vld [vmem:[%s1807_s5 + $0x2] ss:$0 sm:$0xff] }
  0xa5   :  { %1342 = vmatprep.subr.bf16.mxu0 %v1641_v17 }
  0xa6   :  { %1361 = vmatpush3.bf16.msra.mxu1 %v1480_v27 }
  0xa7   :  { %1362 = vmatprep.subr.bf16.mxu1 %v1641_v17 }
  0xa8   :  { %1343 = vmatpush3.bf16.msra.mxu0 %v1473_v20 }
  0xa9   :  { %1344 = vmatprep.subr.bf16.mxu0 %v1641_v17 }
  0xaa   :  { %1363 = vmatpush3.bf16.msra.mxu1 %v1481_v28 }
  0xab   :  { %1364 = vmatprep.subr.bf16.mxu1 %v1641_v17 }
  0xac   :  { %1345 = vmatpush3.bf16.msra.mxu0 %v1474_v21 }
  0xad   :  { %1346 = vmatprep.subr.bf16.mxu0 %v1641_v17 }
  0xae   :  { %1365 = vmatpush3.bf16.msra.mxu1 %v1482_v29 }
  0xaf   :  { %1366 = vmatprep.subr.bf16.mxu1 %v1641_v17 }
  0xb0   :  { %1347 = vmatpush3.bf16.msra.mxu0 %v1475_v22 }
  0xb1   :  { %1348 = vmatprep.subr.bf16.mxu0 %v1641_v17 }
  0xb2   :  { %1367 = vmatpush3.bf16.msra.mxu1 %v1483_v30 }
  0xb3   :  { %1368 = vmatprep.subr.bf16.mxu1 %v1641_v17 }
  0xb4   :  { %1349 = vmatpush3.bf16.msra.mxu0 %v1476_v23 }
  0xb5   :  { %1350 = vmatprep.subr.bf16.mxu0 %v1641_v17 }
  0xb6   :  { %1369 = vmatpush3.bf16.msra.mxu1 %v1484_v56 }
  0xb7   :  { %1370 = vmatprep.subr.bf16.mxu1 %v1641_v17 }
  0xb8   :  { %1351 = vmatpush3.bf16.msra.mxu0 %v1477_v24 }
  0xb9   :  { %1376 = vmatprep.subr.bf16.mxu0 %v1641_v17 }
  0xba   :  { %1371 = vmatpush3.bf16.msra.mxu1 %v1485_v57 }
 0x14e   :  { %v1237_v31 = vpop.f32.mrb[0].mxu0 }
 0x14f   :  { %v1259_v32 = vpop.f32.mrb[0].mxu1  ;;  %v1238_v33 = vpop.f32.mrb[1].mxu0 }
 0x150   :  { %v1260_v34 = vpop.f32.mrb[1].mxu1  ;;  %v1239_v35 = vadd.f32 %v1238_v33, %v1237_v31  ;;  %v1240_v37 = vpop.f32.mrb[2].mxu0 }
 0x151   :  { %v1261_v36 = vadd.f32 %v1260_v34, %v1259_v32  ;;  %v1262_v38 = vpop.f32.mrb[2].mxu1  ;;  %v1241_v39 = vpop.f32.mrb[3].mxu0 }
 0x152   :  { %v1263_v40 = vpop.f32.mrb[3].mxu1 }
 0x153   :  { %v694_v41 = vadd.f32 %v1261_v36, %v1239_v35 }
 0x16e   :  { %v1281_v42 = vpop.f32.mrb[4].mxu0 }
 0x16f   :  { %v1303_v43 = vpop.f32.mrb[4].mxu1  ;;  %v1282_v44 = vpop.f32.mrb[5].mxu0 }
 0x170   :  { %v1283_v45 = vadd.f32 %v1282_v44, %v1281_v42  ;;  %v1304_v46 = vpop.f32.mrb[5].mxu1  ;;  %v1284_v47 = vpop.f32.mrb[6].mxu0 }
 0x171   :  { %v1305_v48 = vadd.f32 %v1304_v46, %v1303_v43  ;;  %v1306_v49 = vpop.f32.mrb[6].mxu1  ;;  %v1285_v50 = vpop.f32.mrb[7].mxu0 }
 0x172   :  { %v734_v51 = vadd.f32 %v1283_v45, %v694_v41  ;;  %v1307_v52 = vpop.f32.mrb[7].mxu1 }
 0x174   :  { %v774_v53 = vadd.f32 %v1305_v48, %v734_v51 }
 0x176   :  { %v779_v54 = vmax.f32 %v774_v53, 0.0 }
 0x178   :  { %v780_v55 = vpack.c.bf16 %v779_v54, %v779_v54 }
 0x17a   :  { %1353 = vmatmul.mubr.bf16.vlgmr.msra.gmra.mrb[8].mxu0 %v780_v55 }
 0x17b   :  { %1392 = vmatprep.mubr.msk.bf16.mxu0 %vm1642_vm0, %v1641_v17  ;;  %1377 = vmatpush3.bf16.msra.mxu0 %v1486_v58 }
 0x17c   :  { %1378 = vmatprep.subr.bf16.mxu0 %v1641_v17 }
 0x17f   :  { %1379 = vmatpush3.bf16.msra.mxu0 %v1487_v59 }
 0x180   :  { %1380 = vmatprep.subr.bf16.mxu0 %v1641_v17 }
 0x183   :  { %1381 = vmatpush3.bf16.msra.mxu0 %v1488_v60 }
 0x184   :  { %1382 = vmatprep.subr.bf16.mxu0 %v1641_v17 }
 0x187   :  { %1383 = vmatpush3.bf16.msra.mxu0 %v1489_v61 }
 0x188   :  { %1384 = vmatprep.subr.bf16.mxu0 %v1641_v17 }
 0x18b   :  { %1385 = vmatpush3.bf16.msra.mxu0 %v1490_v62 }
 0x18c   :  { %1386 = vmatprep.subr.bf16.mxu0 %v1641_v17 }
 0x18f   :  { %1387 = vmatpush3.bf16.msra.mxu0 %v1491_v63 }
 0x190   :  { %1388 = vmatprep.subr.bf16.mxu0 %v1641_v17 }
 0x193   :  { %1389 = vmatpush3.bf16.msra.mxu0 %v1492_v8 }
 0x194   :  { %1390 = vmatprep.subr.bf16.mxu0 %v1641_v17 }
 0x197   :  { %1391 = vmatpush3.bf16.msra.mxu0 %v1493_v9 }
 0x24d   :  { %v884_v1 = vpop.f32.mrb[8].mxu0 }
 0x24e   :  { %v885_v2 = vadd.f32 %v1194_v0, %v884_v1  ;;  %v1354_v3 = vpop.f32.mrb[9].mxu0 }
 0x24f   :  { %v887_v4 = vpop.f32.mrb[10].mxu0 }
 0x250   :  { %v890_v5 = vmax.f32 %v885_v2, 0.0  ;;  %v1355_v6 = vpop.f32.mrb[11].mxu0 }
 0x252   :  { %v891_v7 = vpack.c.bf16 %v890_v5, %v890_v5 }
 0x254   :  { %1373 = vmatmul.mubr.bf16.vlgmr.msra.gmra.mrb[8].mxu1 %v891_v7 }
 0x327   :  { %v995_v11 = vpop.f32.mrb[8].mxu1 }
 0x328   :  { %v996_v12 = vadd.f32 %v1203_v10, %v995_v11  ;;  %v1374_v13 = vpop.f32.mrb[9].mxu1 }
 0x329   :  { %v998_v14 = vpop.f32.mrb[10].mxu1 }
 0x32a   :  { %v1001_v15 = vmax.f32 %v996_v12, 0.0  ;;  %v1375_v16 = vpop.f32.mrb[11].mxu1 }
 0x32c   :  { %v1002_v18 = vpack.c.bf16 %v1001_v15, %v1001_v15 }
 0x32e   :  { %1393 = vmatmul.mubr.bf16.vlgmr.msra.gmra.mrb[12].mxu0 %v1002_v18 }
 0x401   :  { %v1106_v17 = vpop.f32.mrb[12].mxu0 }
 0x402   :  { %v1107_v20 = vadd.f32 %v1212_v19, %v1106_v17  ;;  %v1394_v21 = vpop.f32.mrb[13].mxu0 }
 0x403   :  { %v1109_v22 = vpop.f32.mrb[14].mxu0 }
 0x404   :  { %1112 = vst [vmem:[#allocation11] sm:$0xff] %v1107_v20  ;;  %v1395_v23 = vpop.f32.mrb[15].mxu0 }
 0x405   :  { %1615 = shalt.err (!%p1612_p2)
}
 0x406   :  { %s1616_s5 = scalar_lea.hbm %s1808_s6, 128 }
 0x407   :  { %p1617_p3 = scmp.ne.s32.totalorder %s1808_s6, %s1616_s5  ;;  %p1620_p4 = scmp.lt.u32.totalorder %s1616_s5, %s1808_s6 }
 0x409   :  { %p1622_p5 = pnand %p1620_p4, %p1617_p3 }
 0x40b   :  { %1625 = shalt.err (!%p1622_p5)
}
 0x40c   :  { %1122 = dma.vmem_to_hbm [thread:$0]  %s1120_s13, 128, %s1808_s6, [#allocation4]  }
 0x40d   :  { %1632 = dma.done.wait [#allocation4], 128  }
 0x40e   :  { %1633 = vsyncadd [#allocation4], 4294967168 }
 0x40f   :  { %1126 = vsyncpa [#allocation3], 1 }
 0x410   :  { %1127 = vsyncpa [#allocation6], 1 }
 0x411   :  { %1128 = vsyncpa [#allocation9], 1 }
 0x412   :  { %1129 = vsyncpa [#allocation4], 1 }

</bundles_post_ra>
